<compile_context>
chip_gen: v6e
topology: v6e:2x2x1
jax: 0.10.0
libtpu: 0.0.40
codegen_flags: <defaults>
</compile_context>

<pallas_src>
import functools

import jax
import jax.numpy as jnp
from jax.experimental import pallas as pl
from jax.experimental.pallas import tpu as pltpu


def _gru_seq_kernel(tok_ref, emb_ref, h0_ref, wih_ref, whh_ref, bi_ref, bhn_ref,
                    out_ref, hn_ref, h_carry):
    """One (layer l, time t) grid step of the stacked GRU (batch = 1).

    Prefetch:
      tok_ref : (T,)          int32  SMEM  token ids
    Inputs (VMEM blocks):
      emb_ref : (V, 1, Hp)    f32   embedding table (resident, constant block)
      h0_ref  : (1, 1, Hp)    f32   layer-l initial hidden state
      wih_ref : (1, Hp, 3Hp)  bf16  layer-l input weights,  gates [r|z|n] along H_out
      whh_ref : (1, Hp, 3Hp)  bf16  layer-l hidden weights, gates [r|z|n] along H_out
      bi_ref  : (1, 1, 3Hp)   f32   [b_ih_r+b_hh_r | b_ih_z+b_hh_z | b_ih_n]
      bhn_ref : (1, 1, Hp)    f32   b_hh_n (scaled by r inside the n gate)
    Outputs (VMEM blocks):
      out_ref : (T, 1, Hp)    f32   resident activation buffer; after the last
                                    layer it holds the GRU output sequence
      hn_ref  : (1, 1, Hp)    f32   layer-l final hidden state
    Scratch:
      h_carry : (1, Hp)       f32   hidden state carried across time steps
    """
    l = pl.program_id(0)
    t = pl.program_id(1)
    hp = h_carry.shape[-1]

    @pl.when(t == 0)
    def _():                                   # new layer: load its initial hidden
        h_carry[...] = h0_ref[0]

    # Layer 0 consumes the embedded token (in-kernel gather via the prefetched
    # token id); deeper layers consume the previous layer's output at time t,
    # which lives in the resident out_ref buffer.
    x_emb = emb_ref[tok_ref[t]]                              # (1, Hp) f32
    x = jnp.where(l == 0, x_emb, out_ref[t])                 # (1, Hp) f32
    h = h_carry[...]                                         # (1, Hp) f32

    mm = wih_ref.dtype                                       # bf16 MXU operands
    i_all = jnp.dot(x.astype(mm), wih_ref[0],
                    preferred_element_type=jnp.float32) + bi_ref[0]    # (1, 3Hp)
    h_all = jnp.dot(h.astype(mm), whh_ref[0],
                    preferred_element_type=jnp.float32)                # (1, 3Hp)

    # PyTorch GRU gate math (order [r, z, n]), lane-aligned slices (Hp % 128 == 0).
    r = jax.nn.sigmoid(i_all[:, :hp] + h_all[:, :hp])
    z = jax.nn.sigmoid(i_all[:, hp:2 * hp] + h_all[:, hp:2 * hp])
    n = jnp.tanh(i_all[:, 2 * hp:] + r * (h_all[:, 2 * hp:] + bhn_ref[0]))
    h_new = (1.0 - z) * n + z * h                                      # (1, Hp)

    h_carry[...] = h_new
    out_ref[t] = h_new          # next layer's input / final-layer output
    hn_ref[0] = h_new           # layer-final value is what gets written back


def gru_forward(tokens, h0, emb, w_ih, w_hh, b_i, b_hn):
    """tokens (T,) i32; h0 (L,1,Hp) f32; emb (V,1,Hp) f32; w_* (L,Hp,3Hp) bf16;
    b_i (L,1,3Hp) f32; b_hn (L,1,Hp) f32.  Returns (out_seq (T,1,Hp), hn (L,1,Hp))."""
    num_layers, _, hp = h0.shape
    vocab = emb.shape[0]
    t_len = tokens.shape[0]

    # VMEM budget: double-buffered per-layer weights + resident embedding /
    # activations, generous headroom, capped at 48 MiB (v7x-safe).
    per_layer_w = 2 * hp * 3 * hp * w_ih.dtype.itemsize            # w_ih + w_hh
    resident = 2 * per_layer_w + (vocab + t_len + 3 * num_layers + 16) * hp * 4
    vmem_limit = int(min(48 << 20, max(16 << 20, 4 * resident)))

    return pl.pallas_call(
        _gru_seq_kernel,
        out_shape=(jax.ShapeDtypeStruct((t_len, 1, hp), jnp.float32),
                   jax.ShapeDtypeStruct((num_layers, 1, hp), jnp.float32)),
        grid_spec=pltpu.PrefetchScalarGridSpec(
            num_scalar_prefetch=1,
            grid=(num_layers, t_len),              # layer-major; time innermost
            in_specs=[
                pl.BlockSpec((vocab, 1, hp), lambda l, t, tok: (0, 0, 0)),   # embedding
                pl.BlockSpec((1, 1, hp), lambda l, t, tok: (l, 0, 0)),       # h0[l]
                pl.BlockSpec((1, hp, 3 * hp), lambda l, t, tok: (l, 0, 0)),  # w_ih[l]
                pl.BlockSpec((1, hp, 3 * hp), lambda l, t, tok: (l, 0, 0)),  # w_hh[l]
                pl.BlockSpec((1, 1, 3 * hp), lambda l, t, tok: (l, 0, 0)),   # fused biases
                pl.BlockSpec((1, 1, hp), lambda l, t, tok: (l, 0, 0)),       # b_hh_n
            ],
            out_specs=[
                pl.BlockSpec((t_len, 1, hp), lambda l, t, tok: (0, 0, 0)),   # output seq
                pl.BlockSpec((1, 1, hp), lambda l, t, tok: (l, 0, 0)),       # hn[l]
            ],
            scratch_shapes=[pltpu.VMEM((1, hp), jnp.float32)],
        ),
        compiler_params=pltpu.CompilerParams(
            dimension_semantics=("arbitrary", "arbitrary"),
            vmem_limit_bytes=vmem_limit),
    )(tokens, emb, h0, w_ih, w_hh, b_i, b_hn)


class EncoderGRUPallas:
    """JAX/Pallas port of the PyTorch EncoderGRU forward pass (eval mode)."""

    def __init__(self, input_size, hidden_size, num_layers, dropout, key):
        del dropout  # eval-mode forward: dropout inactive (see TODO at top)
        self.hidden_size = hidden_size
        self.num_layers = num_layers
        h = hidden_size
        hp = ((h + 127) // 128) * 128            # pad hidden dim to 128 lanes
        self.hidden_pad = hp
        l = num_layers

        bound = 1.0 / (h ** 0.5)
        keys = jax.random.split(key, 5)
        u = lambda k, shape: jax.random.uniform(k, shape, jnp.float32,
                                                minval=-bound, maxval=bound)

        emb = u(keys[0], (input_size, h))
        self.embedding = jnp.pad(emb, ((0, 0), (0, hp - h))).reshape(input_size, 1, hp)

        # PyTorch-layout GRU params: (L,3H,H) weights, (L,3H) biases, gates [r,z,n].
        w_ih = u(keys[1], (l, 3 * h, h))
        w_hh = u(keys[2], (l, 3 * h, h))
        b_ih = u(keys[3], (l, 3 * h))
        b_hh = u(keys[4], (l, 3 * h))

        def pack(w):
            # (L,3H,H) -> per-gate transpose -> zero-pad to (Hp,Hp) -> concat gates
            # along H_out: (L, Hp, 3Hp) with column blocks [r | z | n].
            wt = jnp.swapaxes(w.reshape(l, 3, h, h), -1, -2)          # (L,3,Hin,Hout)
            wt = jnp.pad(wt, ((0, 0), (0, 0), (0, hp - h), (0, hp - h)))
            return wt.transpose(0, 2, 1, 3).reshape(l, hp, 3 * hp)

        self._w_ih_f32 = pack(w_ih)                   # kept only for the f32 check
        self._w_hh_f32 = pack(w_hh)
        self.w_ih = self._w_ih_f32.astype(jnp.bfloat16)   # weight-streaming dtype
        self.w_hh = self._w_hh_f32.astype(jnp.bfloat16)

        bi3 = b_ih.reshape(l, 3, h)
        bh3 = b_hh.reshape(l, 3, h)
        bi_fold = jnp.stack([bi3[:, 0] + bh3[:, 0],   # r: fold ih + hh
                             bi3[:, 1] + bh3[:, 1],   # z: fold ih + hh
                             bi3[:, 2]], axis=1)      # n: input-side bias only
        bi_fold = jnp.pad(bi_fold, ((0, 0), (0, 0), (0, hp - h)))
        self.b_i = bi_fold.reshape(l, 1, 3 * hp).astype(jnp.float32)
        self.b_hn = jnp.pad(bh3[:, 2], ((0, 0), (0, hp - h))).reshape(l, 1, hp)

    def init_hidden(self):
        return jnp.zeros((self.num_layers, 1, self.hidden_size), jnp.float32)

    def _run(self, tokens, hidden):
        h, hp = self.hidden_size, self.hidden_pad
        h0 = jnp.pad(hidden.astype(jnp.float32), ((0, 0), (0, 0), (0, hp - h)))
        out_seq, hn = gru_forward(tokens, h0, self.embedding,
                                  self.w_ih, self.w_hh, self.b_i, self.b_hn)
        return out_seq[..., :h], hn[..., :h]

    @functools.partial(jax.jit, static_argnums=0)
    def __call__(self, token, hidden):
        """Single-token step, exactly like EncoderGRU.forward:
        returns (output (1,1,H), hidden (L,1,H))."""
        tokens = jnp.asarray(token, jnp.int32).reshape(1)
        return self._run(tokens, hidden)

    @functools.partial(jax.jit, static_argnums=0)
    def encode(self, tokens, hidden):
        """Whole-sequence encode: equivalent to T successive forward calls, but
        amortizes the weight DMA over all T tokens inside one kernel call."""
        return self._run(jnp.asarray(tokens, jnp.int32), hidden)


def _reference_forward(model, tokens, hidden, quantized=True):
    """Pure-JAX reference.  quantized=True mirrors the kernel numerics (bf16
    weights / bf16 matmul operands, f32 accumulation); quantized=False uses the
    original f32 weights to bound the bf16 weight-streaming deviation."""
    hp, h, num_layers = model.hidden_pad, model.hidden_size, model.num_layers
    if quantized:
        wi = model.w_ih.astype(jnp.float32)
        wh = model.w_hh.astype(jnp.float32)
        q = lambda v: v.astype(jnp.bfloat16).astype(jnp.float32)
    else:
        wi, wh, q = model._w_ih_f32, model._w_hh_f32, (lambda v: v)
    bi, bhn = model.b_i, model.b_hn
    hi_prec = jax.lax.Precision.HIGHEST

    hs = list(jnp.pad(hidden.astype(jnp.float32), ((0, 0), (0, 0), (0, hp - h))))
    xs = model.embedding[jnp.asarray(tokens, jnp.int32)]      # (T, 1, Hp)
    outs = []
    for t in range(xs.shape[0]):
        x = xs[t]                                             # (1, Hp)
        for l in range(num_layers):
            hcur = hs[l]
            i_all = jnp.dot(q(x), wi[l], precision=hi_prec) + bi[l]
            h_all = jnp.dot(q(hcur), wh[l], precision=hi_prec)
            r = jax.nn.sigmoid(i_all[:, :hp] + h_all[:, :hp])
            z = jax.nn.sigmoid(i_all[:, hp:2 * hp] + h_all[:, hp:2 * hp])
            n = jnp.tanh(i_all[:, 2 * hp:] + r * (h_all[:, 2 * hp:] + bhn[l]))
            x = (1.0 - z) * n + z * hcur
            hs[l] = x
        outs.append(x)
    return jnp.stack(outs)[:, :, :h], jnp.stack(hs)[:, :, :h]


if __name__ == "__main__":
    input_size, hidden_size, num_layers, dropout = 16, 32, 2, 0.1
    key = jax.random.PRNGKey(0)
    k_model, k_tok, k_seq = jax.random.split(key, 3)

    model = EncoderGRUPallas(input_size, hidden_size, num_layers, dropout, k_model)
    hidden0 = model.init_hidden()

    # --- single-token forward (matches EncoderGRU.forward semantics) ---------
    token = int(jax.random.randint(k_tok, (), 0, input_size))
    output, new_hidden = model(token, hidden0)
    jax.block_until_ready((output, new_hidden))
    assert output.shape == (1, 1, hidden_size)
    assert new_hidden.shape == (num_layers, 1, hidden_size)

    ref_out, ref_hid = _reference_forward(model, jnp.array([token]), hidden0)
    assert jnp.allclose(output, ref_out, atol=1e-4), \
        float(jnp.abs(output - ref_out).max())
    assert jnp.allclose(new_hidden, ref_hid, atol=1e-4), \
        float(jnp.abs(new_hidden - ref_hid).max())

    # --- whole-sequence encode (weight DMA amortized over T tokens) ----------
    seq_len = 8
    tokens = jax.random.randint(k_seq, (seq_len,), 0, input_size, dtype=jnp.int32)
    out_seq, hid_seq = model.encode(tokens, hidden0)
    jax.block_until_ready((out_seq, hid_seq))
    assert out_seq.shape == (seq_len, 1, hidden_size)
    assert hid_seq.shape == (num_layers, 1, hidden_size)

    ref_seq, ref_hid2 = _reference_forward(model, tokens, hidden0)
    assert jnp.allclose(out_seq, ref_seq, atol=1e-4), \
        float(jnp.abs(out_seq - ref_seq).max())
    assert jnp.allclose(hid_seq, ref_hid2, atol=1e-4), \
        float(jnp.abs(hid_seq - ref_hid2).max())

    # --- document the bf16 weight-streaming deviation vs full-f32 GRU math ---
    f32_seq, f32_hid = _reference_forward(model, tokens, hidden0, quantized=False)
    assert jnp.allclose(out_seq, f32_seq, atol=2e-2), \
        float(jnp.abs(out_seq - f32_seq).max())

    print("KERNEL_OK")
</pallas_src>

<mosaic_0001>
module attributes {stable_mosaic.version = 11 : i64} {
  func.func @_gru_seq_kernel(%arg0: i32, %arg1: i32, %arg2: memref<1xi32, #tpu.memory_space<smem>>, %arg3: memref<16x1x128xf32, #tpu.memory_space<vmem>>, %arg4: memref<1x1x128xf32, #tpu.memory_space<vmem>>, %arg5: memref<1x128x384xbf16, #tpu.memory_space<vmem>>, %arg6: memref<1x128x384xbf16, #tpu.memory_space<vmem>>, %arg7: memref<1x1x384xf32, #tpu.memory_space<vmem>>, %arg8: memref<1x1x128xf32, #tpu.memory_space<vmem>>, %arg9: memref<1x1x128xf32, #tpu.memory_space<vmem>>, %arg10: memref<1x1x128xf32, #tpu.memory_space<vmem>>, %arg11: memref<1x128xf32, #tpu.memory_space<vmem>>) attributes {dimension_semantics = [#tpu.dimension_semantics<arbitrary>, #tpu.dimension_semantics<arbitrary>], iteration_bounds = array<i64: 2, 1>, scalar_prefetch = 1 : i64, scratch_operands = 1 : i64, tpu.core_type = #tpu.core_type<tc>, window_params = [{pipeline_mode = #tpu.pipeline_mode<synchronous>, transform_indices = @transform_0, window_bounds = array<i64: 16, 1, 128>}, {transform_indices = @transform_1, window_bounds = array<i64: 1, 1, 128>}, {transform_indices = @transform_2, window_bounds = array<i64: 1, 128, 384>}, {transform_indices = @transform_3, window_bounds = array<i64: 1, 128, 384>}, {transform_indices = @transform_4, window_bounds = array<i64: 1, 1, 384>}, {transform_indices = @transform_5, window_bounds = array<i64: 1, 1, 128>}, {pipeline_mode = #tpu.pipeline_mode<synchronous>, transform_indices = @transform_6, window_bounds = array<i64: 1, 1, 128>}, {transform_indices = @transform_7, window_bounds = array<i64: 1, 1, 128>}]} {
    %c0_i32 = arith.constant 0 : i32
    %0 = arith.cmpi eq, %arg1, %c0_i32 : i32
    %1 = arith.extui %0 : i1 to i32
    %c0_i32_0 = arith.constant 0 : i32
    %2 = arith.cmpi ne, %1, %c0_i32_0 : i32
    scf.if %2 {
      %c0_30 = arith.constant 0 : index
      %c0_31 = arith.constant 0 : index
      %c0_32 = arith.constant 0 : index
      %62 = vector.load %arg4[%c0_30, %c0_31, %c0_32] : memref<1x1x128xf32, #tpu.memory_space<vmem>>, vector<1x1x128xf32>
      %63 = vector.shape_cast %62 : vector<1x1x128xf32> to vector<1x128xf32>
      %c0_33 = arith.constant 0 : index
      %c0_34 = arith.constant 0 : index
      %64 = vector.load %arg11[%c0_33, %c0_34] : memref<1x128xf32, #tpu.memory_space<vmem>>, vector<1x128xf32>
      tpu.vector_store %arg11[%c0_33, %c0_34], %63 {strides = array<i32>} : memref<1x128xf32, #tpu.memory_space<vmem>>, vector<1x128xf32>,
    } else {
    }
    %3 = arith.index_cast %arg1 : i32 to index
    %4 = memref.load %arg2[%3] : memref<1xi32, #tpu.memory_space<smem>>
    %5 = arith.index_cast %4 : i32 to index
    %c0 = arith.constant 0 : index
    %c0_1 = arith.constant 0 : index
    %6 = vector.load %arg3[%5, %c0, %c0_1] : memref<16x1x128xf32, #tpu.memory_space<vmem>>, vector<1x1x128xf32>
    %7 = vector.shape_cast %6 : vector<1x1x128xf32> to vector<1x128xf32>
    %c0_i32_2 = arith.constant 0 : i32
    %8 = arith.cmpi eq, %arg0, %c0_i32_2 : i32
    %9 = arith.index_cast %arg1 : i32 to index
    %c0_3 = arith.constant 0 : index
    %c0_4 = arith.constant 0 : index
    %10 = vector.load %arg9[%9, %c0_3, %c0_4] : memref<1x1x128xf32, #tpu.memory_space<vmem>>, vector<1x1x128xf32>
    %11 = vector.shape_cast %10 : vector<1x1x128xf32> to vector<1x128xf32>
    %12 = arith.select %8, %7, %11 : vector<1x128xf32>
    %c0_5 = arith.constant 0 : index
    %c0_6 = arith.constant 0 : index
    %13 = vector.load %arg11[%c0_5, %c0_6] : memref<1x128xf32, #tpu.memory_space<vmem>>, vector<1x128xf32>
    %14 = arith.truncf %12 : vector<1x128xf32> to vector<1x128xbf16>
    %c0_7 = arith.constant 0 : index
    %c0_8 = arith.constant 0 : index
    %c0_9 = arith.constant 0 : index
    %15 = vector.load %arg5[%c0_7, %c0_8, %c0_9] : memref<1x128x384xbf16, #tpu.memory_space<vmem>>, vector<1x128x384xbf16>
    %16 = vector.shape_cast %15 : vector<1x128x384xbf16> to vector<128x384xbf16>
    %cst = arith.constant dense<0.000000e+00> : vector<1x384xf32>
    %17 = tpu.matmul %14, %16, %cst {dimension_numbers = #tpu.dot_dimension_numbers<[1], [0], [0], [1], [0, 0, 1, 1], [], []>} : vector<1x128xbf16>, vector<128x384xbf16>, vector<1x384xf32> -> vector<1x384xf32>
    %c0_10 = arith.constant 0 : index
    %c0_11 = arith.constant 0 : index
    %c0_12 = arith.constant 0 : index
    %18 = vector.load %arg7[%c0_10, %c0_11, %c0_12] : memref<1x1x384xf32, #tpu.memory_space<vmem>>, vector<1x1x384xf32>
    %19 = vector.shape_cast %18 : vector<1x1x384xf32> to vector<1x384xf32>
    %20 = arith.addf %17, %19 : vector<1x384xf32>
    %21 = arith.truncf %13 : vector<1x128xf32> to vector<1x128xbf16>
    %c0_13 = arith.constant 0 : index
    %c0_14 = arith.constant 0 : index
    %c0_15 = arith.constant 0 : index
    %22 = vector.load %arg6[%c0_13, %c0_14, %c0_15] : memref<1x128x384xbf16, #tpu.memory_space<vmem>>, vector<1x128x384xbf16>
    %23 = vector.shape_cast %22 : vector<1x128x384xbf16> to vector<128x384xbf16>
    %cst_16 = arith.constant dense<0.000000e+00> : vector<1x384xf32>
    %24 = tpu.matmul %21, %23, %cst_16 {dimension_numbers = #tpu.dot_dimension_numbers<[1], [0], [0], [1], [0, 0, 1, 1], [], []>} : vector<1x128xbf16>, vector<128x384xbf16>, vector<1x384xf32> -> vector<1x384xf32>
    %25 = vector.extract_strided_slice %20 {offsets = [0, 0], sizes = [1, 128], strides = [1, 1]} : vector<1x384xf32> to vector<1x128xf32>
    %26 = vector.extract_strided_slice %24 {offsets = [0, 0], sizes = [1, 128], strides = [1, 1]} : vector<1x384xf32> to vector<1x128xf32>
    %27 = arith.addf %25, %26 : vector<1x128xf32>
    %28 = arith.negf %27 : vector<1x128xf32>
    %29 = math.exp %28 : vector<1x128xf32>
    %cst_17 = arith.constant 1.000000e+00 : f32
    %30 = vector.broadcast %cst_17 : f32 to vector<1x128xf32>
    %31 = arith.addf %30, %29 : vector<1x128xf32>
    %32 = arith.divf %30, %31 : vector<1x128xf32>
    %33 = vector.extract_strided_slice %20 {offsets = [0, 128], sizes = [1, 128], strides = [1, 1]} : vector<1x384xf32> to vector<1x128xf32>
    %34 = vector.extract_strided_slice %24 {offsets = [0, 128], sizes = [1, 128], strides = [1, 1]} : vector<1x384xf32> to vector<1x128xf32>
    %35 = arith.addf %33, %34 : vector<1x128xf32>
    %36 = arith.negf %35 : vector<1x128xf32>
    %37 = math.exp %36 : vector<1x128xf32>
    %cst_18 = arith.constant 1.000000e+00 : f32
    %38 = vector.broadcast %cst_18 : f32 to vector<1x128xf32>
    %39 = arith.addf %38, %37 : vector<1x128xf32>
    %40 = arith.divf %38, %39 : vector<1x128xf32>
    %41 = vector.extract_strided_slice %20 {offsets = [0, 256], sizes = [1, 128], strides = [1, 1]} : vector<1x384xf32> to vector<1x128xf32>
    %42 = vector.extract_strided_slice %24 {offsets = [0, 256], sizes = [1, 128], strides = [1, 1]} : vector<1x384xf32> to vector<1x128xf32>
    %c0_19 = arith.constant 0 : index
    %c0_20 = arith.constant 0 : index
    %c0_21 = arith.constant 0 : index
    %43 = vector.load %arg8[%c0_19, %c0_20, %c0_21] : memref<1x1x128xf32, #tpu.memory_space<vmem>>, vector<1x1x128xf32>
    %44 = vector.shape_cast %43 : vector<1x1x128xf32> to vector<1x128xf32>
    %45 = arith.addf %42, %44 : vector<1x128xf32>
    %46 = arith.mulf %32, %45 : vector<1x128xf32>
    %47 = arith.addf %41, %46 : vector<1x128xf32>
    %48 = math.tanh %47 : vector<1x128xf32>
    %cst_22 = arith.constant 1.000000e+00 : f32
    %49 = vector.broadcast %cst_22 : f32 to vector<1x128xf32>
    %50 = arith.subf %49, %40 : vector<1x128xf32>
    %51 = arith.mulf %50, %48 : vector<1x128xf32>
    %52 = arith.mulf %40, %13 : vector<1x128xf32>
    %53 = arith.addf %51, %52 : vector<1x128xf32>
    %c0_23 = arith.constant 0 : index
    %c0_24 = arith.constant 0 : index
    %54 = vector.load %arg11[%c0_23, %c0_24] : memref<1x128xf32, #tpu.memory_space<vmem>>, vector<1x128xf32>
    tpu.vector_store %arg11[%c0_23, %c0_24], %53 {strides = array<i32>} : memref<1x128xf32, #tpu.memory_space<vmem>>, vector<1x128xf32>,
    %55 = arith.index_cast %arg1 : i32 to index
    %c0_25 = arith.constant 0 : index
    %c0_26 = arith.constant 0 : index
    %56 = vector.load %arg9[%55, %c0_25, %c0_26] : memref<1x1x128xf32, #tpu.memory_space<vmem>>, vector<1x1x128xf32>
    %57 = vector.shape_cast %56 : vector<1x1x128xf32> to vector<1x128xf32>
    %58 = vector.shape_cast %53 : vector<1x128xf32> to vector<1x1x128xf32>
    tpu.vector_store %arg9[%55, %c0_25, %c0_26], %58 {strides = array<i32>} : memref<1x1x128xf32, #tpu.memory_space<vmem>>, vector<1x1x128xf32>,
    %c0_27 = arith.constant 0 : index
    %c0_28 = arith.constant 0 : index
    %c0_29 = arith.constant 0 : index
    %59 = vector.load %arg10[%c0_27, %c0_28, %c0_29] : memref<1x1x128xf32, #tpu.memory_space<vmem>>, vector<1x1x128xf32>
    %60 = vector.shape_cast %59 : vector<1x1x128xf32> to vector<1x128xf32>
    %61 = vector.shape_cast %53 : vector<1x128xf32> to vector<1x1x128xf32>
    tpu.vector_store %arg10[%c0_27, %c0_28, %c0_29], %61 {strides = array<i32>} : memref<1x1x128xf32, #tpu.memory_space<vmem>>, vector<1x1x128xf32>,
    return
  }
  func.func @transform_0(%arg0: i32, %arg1: i32, %arg2: memref<1xi32, #tpu.memory_space<smem>>) -> (i32, i32, i32) {
    %c0_i32 = arith.constant 0 : i32
    %c0_i32_0 = arith.constant 0 : i32
    %c0_i32_1 = arith.constant 0 : i32
    %c0_i32_2 = arith.constant 0 : i32
    return %c0_i32, %c0_i32_0, %c0_i32_1 : i32, i32, i32
  }
  func.func @transform_1(%arg0: i32, %arg1: i32, %arg2: memref<1xi32, #tpu.memory_space<smem>>) -> (i32, i32, i32) {
    %c0_i32 = arith.constant 0 : i32
    %c0_i32_0 = arith.constant 0 : i32
    %c0_i32_1 = arith.constant 0 : i32
    return %arg0, %c0_i32, %c0_i32_0 : i32, i32, i32
  }
  func.func @transform_2(%arg0: i32, %arg1: i32, %arg2: memref<1xi32, #tpu.memory_space<smem>>) -> (i32, i32, i32) {
    %c0_i32 = arith.constant 0 : i32
    %c0_i32_0 = arith.constant 0 : i32
    %c0_i32_1 = arith.constant 0 : i32
    return %arg0, %c0_i32, %c0_i32_0 : i32, i32, i32
  }
  func.func @transform_3(%arg0: i32, %arg1: i32, %arg2: memref<1xi32, #tpu.memory_space<smem>>) -> (i32, i32, i32) {
    %c0_i32 = arith.constant 0 : i32
    %c0_i32_0 = arith.constant 0 : i32
    %c0_i32_1 = arith.constant 0 : i32
    return %arg0, %c0_i32, %c0_i32_0 : i32, i32, i32
  }
  func.func @transform_4(%arg0: i32, %arg1: i32, %arg2: memref<1xi32, #tpu.memory_space<smem>>) -> (i32, i32, i32) {
    %c0_i32 = arith.constant 0 : i32
    %c0_i32_0 = arith.constant 0 : i32
    %c0_i32_1 = arith.constant 0 : i32
    return %arg0, %c0_i32, %c0_i32_0 : i32, i32, i32
  }
  func.func @transform_5(%arg0: i32, %arg1: i32, %arg2: memref<1xi32, #tpu.memory_space<smem>>) -> (i32, i32, i32) {
    %c0_i32 = arith.constant 0 : i32
    %c0_i32_0 = arith.constant 0 : i32
    %c0_i32_1 = arith.constant 0 : i32
    return %arg0, %c0_i32, %c0_i32_0 : i32, i32, i32
  }
  func.func @transform_6(%arg0: i32, %arg1: i32, %arg2: memref<1xi32, #tpu.memory_space<smem>>) -> (i32, i32, i32) {
    %c0_i32 = arith.constant 0 : i32
    %c0_i32_0 = arith.constant 0 : i32
    %c0_i32_1 = arith.constant 0 : i32
    %c0_i32_2 = arith.constant 0 : i32
    return %c0_i32, %c0_i32_0, %c0_i32_1 : i32, i32, i32
  }
  func.func @transform_7(%arg0: i32, %arg1: i32, %arg2: memref<1xi32, #tpu.memory_space<smem>>) -> (i32, i32, i32) {
    %c0_i32 = arith.constant 0 : i32
    %c0_i32_0 = arith.constant 0 : i32
    %c0_i32_1 = arith.constant 0 : i32
    return %arg0, %c0_i32, %c0_i32_0 : i32, i32, i32
  }
}

</mosaic_0001>

<bundles_post_ra>
// kernel: a_call__.1
= control target key start
LH: loop header
LB: loop body
LE: loop exit
PB: predicated region body
PF: predicated region fallthrough
CT: control target
= control target key end

     0   :  { %s2002_s0 = inlined_call_operand.<no memory space> [shape: s32[1], index: 0, kind: input, shape index: {}]   ;;  %s2003_s1 = inlined_call_operand.hbm [shape: f32[16,1,128], index: 1, kind: input, shape index: {}]   ;;  %s2004_s2 = inlined_call_operand.vmem [shape: f32[2,1,128], index: 2, kind: input, shape index: {}]   ;;  %s2005_s3 = inlined_call_operand.hbm [shape: bf16[2,128,384], index: 3, kind: input, shape index: {}]   ;;  %s2006_s4 = inlined_call_operand.hbm [shape: bf16[2,128,384], index: 4, kind: input, shape index: {}]   ;;  %s2007_s5 = inlined_call_operand.vmem [shape: f32[2,1,384], index: 5, kind: input, shape index: {}]   ;;  %s2008_s6 = inlined_call_operand.vmem [shape: f32[2,1,128], index: 6, kind: input, shape index: {}]   ;;  %s2009_s7 = inlined_call_operand.hbm [shape: f32[1,1,128], index: 7, kind: output, shape index: {0}]   ;;  %s2010_s8 = inlined_call_operand.hbm [shape: f32[2,1,128], index: 8, kind: output, shape index: {1}]  }
   0x1   :  { %2018 = sst [smem:[#allocation20_spill]] %s2005_s3 }
   0x2   :  { %2019 = sst [smem:[#allocation21_spill]] %s2006_s4 }
   0x3   :  { %14 = sst [smem:[#allocation4]] %s2002_s0 }
   0x4   :  { %15 = vsyncpa [#allocation6], 0 }
   0x5   :  { %16 = vsyncpa [#allocation9], 0 }
   0x6   :  { %18 = vsyncpa [#allocation9 + $0x1], 0 }
   0x7   :  { %19 = vsyncpa [#allocation7], 0 }
   0x8   :  { %20 = vsyncpa [#allocation13], 0 }
   0x9   :  { %22 = vsyncpa [#allocation13 + $0x1], 0  ;;  %s1676_s29 = smov 0   ;;  %s1678_s30 = smov 0  }
   0xa   :  { %s1680_s9 = smov 0   ;;  %s1682_s10 = smov 0  }
   0xb   :  { %s1684_s11 = smov 0   ;;  %s1686_s12 = smov 0  }
   0xc LB: > { %2020 = sst [smem:[#allocation18_spill]] %s1610_s11  ;;  %s40_s0 = sadd.s32 1, %s1610_s11  ;;  %s1614_s12 = sphi %s1686_s12, %s28_s12   ;;  %s1610_s11 = sphi %s1684_s11, %s2041_s11   ;;  %s1606_s10 = sphi %s1682_s10, %s2040_s10   ;;  %s1602_s9 = sphi %s1680_s9, %s2044_s9   ;;  %s1598_s30 = sphi %s1678_s30, %s2043_s30   ;;  %s1594_s29 = sphi %s1676_s29, %s2042_s29  }
   0xd   : > { %s94_s13 = sadd.s32 1, %s1602_s9  ;;  %p42_p0 = scmp.ge.s32.totalorder %s40_s0, 2 }
   0xe   : > { %p101_p1 = scmp.ne.s32.totalorder %s1602_s9, %s1598_s30  ;;  %p102_p2 = scmp.eq.s32.totalorder %s1614_s12, 0 }
   0xf   : > { %s2046_s0 = smov (%p42_p0, %s40_s0), 0  ;;  %p1284_p5 = scmp.lt.s32.totalorder %s1614_s12, 2 }
  0x10   : > { %2021 = sst [smem:[#allocation19_spill]] %s2046_s0  ;;  %p103_p4 = por %p102_p2, %p101_p1 }
  0x11   : > { %s91_s14 = ssub.s32 %s1610_s11, %s2046_s0  ;;  %s275_s15 = sand.u32 1, %s1614_s12  }
  0x12   : > { %p92_p6 = scmp.eq.s32.totalorder %s91_s14, 0  ;;  %s277_s16 = sand.u32 1, %s1602_s9  }
  0x13   : > { %s1249_s17 = smul.u32 3072, %s1610_s11  ;;  %s2022_s3 = sld [smem:[#allocation20_spill]] }
  0x14   : > { %s1724_s18 = scalar_select %p92_p6, %s1602_s9, %s94_s13  }
  0x15   : > { %s1726_s19 = smul.u32 192, %s277_s16  ;;  %p1733_p7 = pnand %p1284_p5, %p103_p4 }
  0x16   : > { %s1738_s26 = scalar_lea.sflag [#allocation9], %s275_s15  ;;  %s1616_s28 = smov [#allocation8]  }
  0x17   : > { %s279_s24 = scalar_lea.vmem [#allocation8], %s1726_s19  ;;  %p2016_p8 = pneg %p1733_p7 }
  0x18   : > { %s286_s25 = sshll.u32 %s279_s24, 4  ;;  %s1438_s13 = sshll.u32 %s1616_s28, 4  ;;  %s287_s25 = int_to_ptr.vmem [resolvable:$true] %s286_s25  ;;  %s1439_s13 = int_to_ptr.vmem [resolvable:$false] %s1438_s13 }
  0x19   : > { %s285_s22 = scalar_lea.hbm %s2022_s3, %s1249_s17  ;;  %s1433_s27 = scalar_lea.vmem %s287_s25, 3072 }
  0x1a   : > { %p1434_p9 = scmp.ne.s32.totalorder %s287_s25, %s1433_s27  ;;  %s1440_s14 = scalar_lea.vmem %s1439_s13, 6144 }
  0x1b   : > { %p1441_p12 = scmp.lt.s32.totalorder %s287_s25, %s1439_s13  ;;  %p1442_p13 = scmp.lt.s32.totalorder %s1440_s14, %s1433_s27 }
  0x1c   : > { %p1436_p10 = pnand %p1434_p9, %p2016_p8 }
  0x1d   : > { %p1443_p0 = por %p1442_p13, %p1441_p12 }
  0x1e   : > { %p1437_p11 = pneg %p1436_p10 }
  0x20   : > { %p1444_p2 = pnand %p1443_p0, %p1437_p11 }
  0x22   : > { %1447 = shalt.err (!%p1444_p2)
}
  0x23   : > { %s2011_s16 = smov 192   ;;  %s2012_s15 = smov 12  }
  0x24   : > { %1275 = dma.hbm_to_vmem [thread:$0]  (!%p1733_p7), %s285_s22, 3072, %s287_s25, %s1738_s26, %s2011_s16, %s2011_s16, %s2012_s15  }
  0x25   : > { %s1752_s20 = sadd.s32 4294967295, %s1614_s12   ;;  %s1127_s21 = sadd.s32 4294967294, %s1614_s12  }
  0x26   : > { %p107_p4 = scmp.ne.s32.totalorder %s1598_s30, %s1594_s29  ;;  %p2015_p5 = scmp.eq.s32.totalorder %s1752_s20, 0 }
  0x27   : > { %p2014_p6 = scmp.eq.s32.totalorder %s1752_s20, 1  ;;  %p236_p9 = scmp.eq.s32.totalorder %s1127_s21, 1 }
  0x28   : > { %p1128_p10 = scmp.ge.s32.totalorder %s1614_s12, 1  ;;  %p1762_p11 = por %p2015_p5, %p107_p4 }
  0x29   : > { %p1771_p12 = por %p2014_p6, %p101_p1  ;;  %p1775_p13 = por %p236_p9, %p107_p4 }
  0x2a   : > { %p243_p0 = scmp.lt.s32.totalorder %s1614_s12, 3  ;;  %s1619_s28 = smov [#allocation5]  }
  0x2b   : > { %s255_s13 = sshll.u32 %s1619_s28, 4  ;;  %s300_s21 = scalar_lea.vmem [#allocation10], %s1726_s19  ;;  %s256_s13 = int_to_ptr.vmem [resolvable:$true] %s255_s13 }
  0x2c   : > { %p1780_p2 = pnand %p1128_p10, %p243_p0  ;;  %s307_s16 = sshll.u32 %s300_s21, 4  ;;  %s1800_s16 = int_to_ptr.vmem [resolvable:$true] %s307_s16 }
  0x2d   : > { %s2029_s4 = sld [smem:[#allocation21_spill]]  ;;  %s1459_s28 = scalar_lea.vmem %s256_s13, 256 }
  0x2e   : > { %p1268_p3 = pneg %p1780_p2  ;;  %p1460_p9 = scmp.ne.s32.totalorder %s256_s13, %s1459_s28 }
  0x2f   : > { %p1467_p0 = scmp.lt.s32.totalorder %s256_s13, %s256_s13  ;;  %p1468_p6 = scmp.lt.s32.totalorder %s1459_s28, %s1459_s28 }
  0x30   : > { %p1788_p1 = pnand %p1268_p3, %p2015_p5 }
  0x31   : > { %p1469_p5 = por %p1468_p6, %p1467_p0 }
  0x32   : > { %p1450_p4 = pneg %p1788_p1 }
  0x33   : > { %s1798_s0 = scalar_lea.hbm %s2029_s4, %s1249_s17 }
  0x34   : > { %p1462_p10 = pnand %p1460_p9, %p1450_p4 }
  0x36   : > { %p1463_p3 = pneg %p1462_p10 }
  0x38   : > { %p1470_p8 = pnand %p1469_p5, %p1463_p3 }
  0x3a   : > { %1473 = shalt.err (!%p1470_p8)
}
  0x3b   : > { %s1620_s19 = smov 16   ;;  %s1621_s3 = smov 1  }
  0x3c   : > { %1271 = dma.hbm_to_vmem [thread:$0]  (!%p1788_p1), %s2003_s1, 256, %s256_s13, [#allocation6], %s1620_s19, %s1620_s19, %s1621_s3  }
  0x3d   : > { %s1487_s21 = scalar_lea.vmem %s1800_s16, 3072  ;;  %p2030_p9 = pneg %p1733_p7 }
  0x3e   : > { %p1488_p4 = scmp.ne.s32.totalorder %s1800_s16, %s1487_s21  ;;  %s1622_s28 = smov [#allocation10]  }
  0x3f   : > { %s1492_s4 = sshll.u32 %s1622_s28, 4  ;;  %s1493_s4 = int_to_ptr.vmem [resolvable:$false] %s1492_s4 }
  0x40   : > { %p1490_p10 = pnand %p1488_p4, %p2030_p9  ;;  %s1494_s11 = scalar_lea.vmem %s1493_s4, 6144 }
  0x41   : > { %p1495_p8 = scmp.lt.s32.totalorder %s1800_s16, %s1493_s4  ;;  %p1496_p5 = scmp.lt.s32.totalorder %s1494_s11, %s1487_s21 }
  0x42   : > { %p1491_p6 = pneg %p1490_p10 }
  0x43   : > { %p1497_p3 = por %p1496_p5, %p1495_p8 }
  0x45   : > { %p1498_p0 = pnand %p1497_p3, %p1491_p6 }
  0x47   : > { %1501 = shalt.err (!%p1498_p0)
}
  0x48   : > { %s2031_s14 = smov 12   ;;  %s2032_s17 = smov 192  }
  0x49   : > { %1278 = dma.hbm_to_vmem [thread:$0]  (!%p1733_p7), %s1798_s0, 3072, %s1800_s16, %s1738_s26, %s2032_s17, %s2032_s17, %s2031_s14  }
  0x4a   : > { %332 = sbr.rel (%p1780_p2) target bundleno = 431 (0x1af), region = 44  ;;  %p2033_p1 = scmp.eq.s32.totalorder (!%p1780_p2), %s1752_s20, 0 }
  0x4f   : > { %1577 = dma.done.wait (%p2033_p1), [#allocation6], 256   ;;  %p2034_p4 = pmov %p2033_p1 }
  0x50   : > { %s338_s4 = sand.u32 1, %s1752_s20   ;;  %s1831_s11 = sand.u32 1, %s1598_s30  }
  0x51   : > { %1579 = vsyncadd (%p2034_p4), [#allocation6], 4294967040  ;;  %s1252_s23 = smul.u32 192, %s1831_s11  ;;  %s339_s13 = scalar_lea.sflag [#allocation9], %s338_s4 }
  0x53   : > { %s1836_s0 = scalar_lea.vmem [#allocation8], %s1252_s23 }
  0x54   : > { %1581 = dma.done.wait (%p1762_p11), %s339_s13, 6144  }
  0x55   : > { %1583 = vsyncadd (%p1762_p11), %s339_s13, 4294961152  ;;  %v1623_v0 = vmov 0.0   ;;  %v1624_v1 = vmov 0   ;;  %vm1625_vm0 = vmmov 0   ;;  %v1346_v2 = vld [vmem:[%s1836_s0 + $0xac] ss:$12 sps:$4 sm:$0xff]  }
  0x56   : > { %1208 = vmatprep.subr.bf16.mxu1 %v1623_v0  ;;  %634 = vmatprep.mubr.bf16.mxu0 %v1624_v1  ;;  %v1348_v3 = vld [vmem:[%s1836_s0 + $0xa8] ss:$12 sps:$4 sm:$0xff]   ;;  %v1351_v5 = vld [vmem:[%s1836_s0 + $0x90] ss:$12 sps:$4 sm:$0xff]   ;;  %v1354_v7 = vld [vmem:[%s1836_s0 + $0x78] ss:$12 sps:$4 sm:$0xff]  }
  0x57   : > { %1224 = vmatprep.mubr.msk.bf16.mxu1 %vm1625_vm0, %v1623_v0  ;;  %602 = vmatprep.subr.bf16.mxu0 %v1346_v2  ;;  %v1349_v4 = vld [vmem:[%s1836_s0 + $0x94] ss:$12 sps:$4 sm:$0xff]   ;;  %v1352_v6 = vld [vmem:[%s1836_s0 + $0x7c] ss:$12 sps:$4 sm:$0xff]   ;;  %v1355_v8 = vld [vmem:[%s1836_s0 + $0x64] ss:$12 sps:$4 sm:$0xff]   ;;  %v587_v2 = vlaneseq }
  0x58   : > { %603 = vmatpush1.bf16.msra.mxu0 %v1348_v3  ;;  %v1367_v9 = vld [vmem:[%s1836_s0 + $0xb0] ss:$12 sps:$4 sm:$0xff]   ;;  %p416_p7 = scmp.eq.s32.totalorder %s1606_s10, 0  ;;  %v1357_v10 = vld [vmem:[%s1836_s0 + $0x60] ss:$12 sps:$4 sm:$0xff]   ;;  %s413_s26 = sld [smem:[#allocation4]] }
  0x59   : > { %604 = vmatprep.subr.bf16.mxu0 %v1349_v4  ;;  %v1358_v11 = vld [vmem:[%s1836_s0 + $0x4c] ss:$12 sps:$4 sm:$0xff]   ;;  %1209 = vmatpush3.bf16.msra.mxu1 %v1367_v9  ;;  %s1861_s16 = scalar_lea.vmem [#allocation10], %s1252_s23  ;;  %v1360_v13 = vld [vmem:[%s1836_s0 + $0x48] ss:$12 sps:$4 sm:$0xff]   ;;  %p396_p11 = scmp.lt.s32.totalorder %s1606_s10, 1 }
  0x5a   : > { %v1371_v12 = vld [vmem:[%s1836_s0 + $0x98] ss:$12 sps:$4 sm:$0xff]   ;;  %1210 = vmatprep.subr.bf16.mxu1 %v1623_v0  ;;  %s419_s24 = scalar_select %p416_p7, 1, 0  ;;  %v1361_v14 = vld [vmem:[%s1836_s0 + $0x34] ss:$12 sps:$4 sm:$0xff]  }
  0x5b   : > { %v1375_v15 = vld [vmem:[%s1836_s0 + $0x80] ss:$12 sps:$4 sm:$0xff]   ;;  %v1363_v16 = vld [vmem:[%s1836_s0 + $0x30] ss:$12 sps:$4 sm:$0xff]   ;;  %v1379_v19 = vld [vmem:[%s1836_s0 + $0x68] ss:$12 sps:$4 sm:$0xff]  }
  0x5c   : > { %605 = vmatpush1.bf16.msra.mxu0 %v1351_v5  ;;  %v1364_v17 = vld [vmem:[%s1836_s0 + $0x1c] ss:$12 sps:$4 sm:$0xff]   ;;  %v420_v18 = vstv %s419_s24  ;;  %v1366_v20 = vld [vmem:[%s1836_s0 + $0x18] ss:$12 sps:$4 sm:$0xff]   ;;  %v418_v23 = vld [vmem:[#allocation11] sm:$0x1] }
  0x5d   : > { %606 = vmatprep.subr.bf16.mxu0 %v1352_v6  ;;  %1211 = vmatpush3.bf16.msra.mxu1 %v1371_v12  ;;  %v1368_v21 = vld [vmem:[%s1836_s0 + $0x4] ss:$12 sps:$4 sm:$0xff]   ;;  %vm421_vm1 = vcmp.eq.s32.totalorder %v420_v18, 1  ;;  %s1877_s19 = scalar_select %p396_p11, %s1606_s10, 1  ;;  %v1370_v25 = vld [vmem:[%s1836_s0] ss:$12 sps:$4 sm:$0xff]  }
  0x5e   : > { %1212 = vmatprep.subr.bf16.mxu1 %v1623_v0  ;;  %s414_s27 = scalar_lea.vmem [#allocation5], %s413_s26  ;;  %v1383_v24 = vld [vmem:[%s1836_s0 + $0x50] ss:$12 sps:$4 sm:$0xff]   ;;  %v1374_v27 = vld [vmem:[%s1861_s16 + $0xac] ss:$12 sps:$4 sm:$0xff]   ;;  %v588_v4 = vshrl.u32 %v587_v2, 7 }
  0x5f   : > { %v415_v22 = vld [vmem:[%s414_s27] sm:$0x1]  ;;  %v1387_v28 = vld [vmem:[%s1836_s0 + $0x38] ss:$12 sps:$4 sm:$0xff]   ;;  %s398_s21 = scalar_lea.vmem %s2004_s2, %s1877_s19  ;;  %v1372_v30 = vld [vmem:[%s1861_s16 + $0xa8] ss:$12 sps:$4 sm:$0xff]  }
  0x60   : > { %607 = vmatpush1.bf16.msra.mxu0 %v1354_v7  ;;  %v422_v26 = vsel %vm421_vm1, %v415_v22, %v418_v23  ;;  %v1378_v31 = vld [vmem:[%s1861_s16 + $0x94] ss:$12 sps:$4 sm:$0xff]   ;;  %v411_v33 = vld [vmem:[%s398_s21] sm:$0x1]  ;;  %v1376_v34 = vld [vmem:[%s1861_s16 + $0x90] ss:$12 sps:$4 sm:$0xff]  }
  0x61   : > { %608 = vmatprep.subr.bf16.mxu0 %v1355_v8  ;;  %1213 = vmatpush3.bf16.msra.mxu1 %v1375_v15  ;;  %v424_v29 = vpack.c.bf16 %v422_v26, %v422_v26  ;;  %v1391_v32 = vld [vmem:[%s1836_s0 + $0x20] ss:$12 sps:$4 sm:$0xff]   ;;  %412 = vst [vmem:[#allocation2] sm:$0x1] %v411_v33  ;;  %v1382_v35 = vld [vmem:[%s1861_s16 + $0x7c] ss:$12 sps:$4 sm:$0xff]  }
  0x62   : > { %1214 = vmatprep.subr.bf16.mxu1 %v1623_v0  ;;  %v1395_v36 = vld [vmem:[%s1836_s0 + $0x8] ss:$12 sps:$4 sm:$0xff]   ;;  %v1380_v37 = vld [vmem:[%s1861_s16 + $0x78] ss:$12 sps:$4 sm:$0xff]   ;;  %v1399_v39 = vld [vmem:[%s1861_s16 + $0xb0] ss:$12 sps:$4 sm:$0xff]   ;;  %s405_s0 = scalar_lea.vmem %s2008_s6, %s1877_s19 }
  0x63   : > { %v1386_v38 = vld [vmem:[%s1861_s16 + $0x64] ss:$12 sps:$4 sm:$0xff]   ;;  %v1384_v40 = vld [vmem:[%s1861_s16 + $0x60] ss:$12 sps:$4 sm:$0xff]   ;;  %v1388_v43 = vld [vmem:[%s1861_s16 + $0x48] ss:$12 sps:$4 sm:$0xff]  }
  0x64   : > { %609 = vmatpush1.bf16.msra.mxu0 %v1357_v10  ;;  %v1390_v41 = vld [vmem:[%s1861_s16 + $0x4c] ss:$12 sps:$4 sm:$0xff]   ;;  %v1394_v44 = vld [vmem:[%s1861_s16 + $0x34] ss:$12 sps:$4 sm:$0xff]   ;;  %v1392_v46 = vld [vmem:[%s1861_s16 + $0x30] ss:$12 sps:$4 sm:$0xff]  }
  0x65   : > { %610 = vmatprep.subr.bf16.mxu0 %v1358_v11  ;;  %1215 = vmatpush3.bf16.msra.mxu1 %v1379_v19  ;;  %v1403_v42 = vld [vmem:[%s1861_s16 + $0x98] ss:$12 sps:$4 sm:$0xff]   ;;  %v1404_v45 = vld [vmem:[%s1861_s16 + $0x80] ss:$12 sps:$4 sm:$0xff]   ;;  %v1398_v47 = vld [vmem:[%s1861_s16 + $0x1c] ss:$12 sps:$4 sm:$0xff]  }
  0x66   : > { %1216 = vmatprep.subr.bf16.mxu1 %v1623_v0  ;;  %v1405_v48 = vld [vmem:[%s1861_s16 + $0x68] ss:$12 sps:$4 sm:$0xff]   ;;  %v1396_v49 = vld [vmem:[%s1861_s16 + $0x18] ss:$12 sps:$4 sm:$0xff]   ;;  %v1406_v51 = vld [vmem:[%s1861_s16 + $0x50] ss:$12 sps:$4 sm:$0xff]  }
  0x67   : > { %v1402_v50 = vld [vmem:[%s1861_s16 + $0x4] ss:$12 sps:$4 sm:$0xff]   ;;  %v1400_v52 = vld [vmem:[%s1861_s16] ss:$12 sps:$4 sm:$0xff]   ;;  %v1409_v57 = vld [vmem:[%s1861_s16 + $0x8] ss:$12 sps:$4 sm:$0xff]  }
  0x68   : > { %611 = vmatpush1.bf16.msra.mxu0 %v1360_v13  ;;  %v1919_v53 = vld [vmem:[#allocation2] sm:$0x1]  ;;  %v1407_v54 = vld [vmem:[%s1861_s16 + $0x38] ss:$12 sps:$4 sm:$0xff]   ;;  %s1253_s28 = smul.u32 3, %s1877_s19  ;;  %v589_v5 = vsub.s32 0, %v588_v4 }
  0x69   : > { %612 = vmatprep.subr.bf16.mxu0 %v1361_v14  ;;  %1217 = vmatpush3.bf16.msra.mxu1 %v1383_v24  ;;  %v683_v55 = vpack.c.bf16 %v1919_v53, %v1919_v53  ;;  %v1408_v56 = vld [vmem:[%s1861_s16 + $0x20] ss:$12 sps:$4 sm:$0xff]   ;;  %v593_v7 = vsub.s32 1, %v588_v4  ;;  %s1626_s26 = smov [#allocation11]   ;;  %s1186_s24 = sshll.u32 %s1606_s10, 4 }
  0x6a   : > { %1218 = vmatprep.subr.bf16.mxu1 %v1623_v0  ;;  %s402_s4 = scalar_lea.vmem %s2007_s5, %s1253_s28  ;;  %s962_s16 = sshll.u32 %s1626_s26, 4  ;;  %s963_s16 = int_to_ptr.vmem [resolvable:$true] %s962_s16 }
  0x6b   : > { %v457_v6 = vld [vmem:[%s402_s4] sm:$0x7]  ;;  %s395_s27 = scalar_lea.vmem [#allocation12], %s1831_s11  ;;  %s1943_s21 = scalar_lea.hbm %s2010_s8, %s1186_s24 }
  0x6c   : > { %613 = vmatpush1.bf16.msra.mxu0 %v1363_v16  ;;  %v594_v10 = vrot.slane %v457_v6, %v593_v7  ;;  %s975_s19 = sshll.u32 %s395_s27, 4  ;;  %s1502_s28 = scalar_lea.vmem %s963_s16, 16  ;;  %s1945_s19 = int_to_ptr.vmem [resolvable:$true] %s975_s19 }
  0x6d   : > { %614 = vmatprep.subr.bf16.mxu0 %v1364_v17  ;;  %1219 = vmatpush3.bf16.msra.mxu1 %v1387_v28  ;;  %p1503_p2 = scmp.ne.s32.totalorder %s963_s16, %s1502_s28  ;;  %p2035_p9 = scmp.eq.s32.totalorder %s1752_s20, 1 }
  0x6e   : > { %1220 = vmatprep.subr.bf16.mxu1 %v1623_v0  ;;  %s1508_s10 = scalar_lea.vmem %s963_s16, 32  ;;  %p1509_p8 = scmp.lt.s32.totalorder %s963_s16, %s963_s16 }
  0x6f   : > { %p1504_p10 = pnand %p1503_p2, %p2035_p9  ;;  %p1510_p5 = scmp.lt.s32.totalorder %s1508_s10, %s1502_s28 }
  0x70   : > { %615 = vmatpush1.bf16.msra.mxu0 %v1366_v20 }
  0x71   : > { %616 = vmatprep.subr.bf16.mxu0 %v1368_v21  ;;  %1221 = vmatpush3.bf16.msra.mxu1 %v1391_v32  ;;  %p1505_p6 = pneg %p1504_p10  ;;  %p1511_p3 = por %p1510_p5, %p1509_p8 }
  0x72   : > { %1222 = vmatprep.subr.bf16.mxu1 %v1623_v0 }
  0x73   : > { %p1512_p0 = pnand %p1511_p3, %p1505_p6 }
  0x74   : > { %617 = vmatpush1.bf16.msra.mxu0 %v1370_v25  ;;  %v597_v25 = vsub.s32 2, %v588_v4 }
  0x75   : > { %844 = vmatprep.subr.bf16.mxu0 %v1374_v27  ;;  %1223 = vmatpush3.bf16.msra.mxu1 %v1395_v36  ;;  %v939_v27 = vld [vmem:[%s405_s0] sm:$0x1] }
  0x76   : > { %1228 = vmatprep.subr.bf16.mxu1 %v1623_v0  ;;  %v598_v28 = vrot.slane %v457_v6, %v597_v25 }
  0x77   : > { %635 = vmatmul.mubr.bf16.vlgmr.msra.gmra.mxu0 %v424_v29 }
  0x78   : > { %845 = vmatpush1.bf16.msra.mxu0 %v1372_v30  ;;  %876 = vmatprep.mubr.bf16.mxu0 %v1624_v1 }
  0x79   : > { %846 = vmatprep.subr.bf16.mxu0 %v1378_v31  ;;  %1225 = vmatmul.mubr.bf16.vlgmr.msra.gmra.mxu1 %v424_v29 }
  0x7a   : > { %1229 = vmatpush3.bf16.msra.mxu1 %v1399_v39  ;;  %1244 = vmatprep.mubr.msk.bf16.mxu1 %vm1625_vm0, %v1623_v0 }
  0x7b   : > { %1230 = vmatprep.subr.bf16.mxu1 %v1623_v0 }
  0x7c   : > { %847 = vmatpush1.bf16.msra.mxu0 %v1376_v34 }
  0x7d   : > { %848 = vmatprep.subr.bf16.mxu0 %v1382_v35 }
  0x7e   : > { %1231 = vmatpush3.bf16.msra.mxu1 %v1403_v42 }
  0x7f   : > { %1232 = vmatprep.subr.bf16.mxu1 %v1623_v0 }
  0x80   : > { %849 = vmatpush1.bf16.msra.mxu0 %v1380_v37 }
  0x81   : > { %850 = vmatprep.subr.bf16.mxu0 %v1386_v38 }
  0x82   : > { %1233 = vmatpush3.bf16.msra.mxu1 %v1404_v45 }
  0x83   : > { %1234 = vmatprep.subr.bf16.mxu1 %v1623_v0 }
  0x84   : > { %851 = vmatpush1.bf16.msra.mxu0 %v1384_v40 }
  0x85   : > { %852 = vmatprep.subr.bf16.mxu0 %v1390_v41 }
  0x86   : > { %1235 = vmatpush3.bf16.msra.mxu1 %v1405_v48 }
  0x87   : > { %1236 = vmatprep.subr.bf16.mxu1 %v1623_v0 }
  0x88   : > { %853 = vmatpush1.bf16.msra.mxu0 %v1388_v43 }
  0x89   : > { %854 = vmatprep.subr.bf16.mxu0 %v1394_v44 }
  0x8a   : > { %1237 = vmatpush3.bf16.msra.mxu1 %v1406_v51 }
  0x8b   : > { %1238 = vmatprep.subr.bf16.mxu1 %v1623_v0 }
  0x8c   : > { %855 = vmatpush1.bf16.msra.mxu0 %v1392_v46 }
  0x8d   : > { %856 = vmatprep.subr.bf16.mxu0 %v1398_v47 }
  0x8e   : > { %1239 = vmatpush3.bf16.msra.mxu1 %v1407_v54 }
  0x8f   : > { %1240 = vmatprep.subr.bf16.mxu1 %v1623_v0 }
  0x90   : > { %857 = vmatpush1.bf16.msra.mxu0 %v1396_v49 }
  0x91   : > { %858 = vmatprep.subr.bf16.mxu0 %v1402_v50 }
  0x92   : > { %1241 = vmatpush3.bf16.msra.mxu1 %v1408_v56 }
  0x93   : > { %1242 = vmatprep.subr.bf16.mxu1 %v1623_v0  ;;  %v590_v0 = vrot.slane %v457_v6, %v589_v5 }
  0x94   : > { %859 = vmatpush1.bf16.msra.mxu0 %v1400_v52 }
  0x96   : > { %1243 = vmatpush3.bf16.msra.mxu1 %v1409_v57 }
  0x97   : > { %877 = vmatmul.mubr.bf16.vlgmr.msra.gmra.mxu0 %v683_v55 }
  0x99   : > { %1245 = vmatmul.mubr.bf16.vlgmr.msra.gmra.mxu1 %v683_v55 }
 0x137   : > { %v636_v58 = vpop.f32.mrf.mxu0 }
 0x138   : > { %v637_v8 = vadd.f32 %v636_v58, %v590_v0 }
 0x139   : > { %v638_v59 = vpop.f32.mrf.mxu0  ;;  %v677_v62 = vpop.f32.mrf.mxu1 }
 0x13a   : > { %v639_v15 = vadd.f32 %v638_v59, %v594_v10  ;;  %v678_v32 = vadd.f32 %v677_v62, %v598_v28 }
 0x13b   : > { %v640_v60 = vpop.f32.mrf.mxu0  ;;  %v1226_v63 = vpop.f32.mrf.mxu1 }
 0x13d   : > { %v641_v61 = vpop.f32.mrf.mxu0  ;;  %v680_v1 = vpop.f32.mrf.mxu1 }
 0x13f   : > { %v1227_v3 = vpop.f32.mrf.mxu1 }
 0x157   : > { %v878_v9 = vpop.f32.mrf.mxu0 }
 0x158   : > { %v925_v11 = vadd.f32 %v878_v9, %v637_v8 }
 0x159   : > { %v880_v12 = vpop.f32.mrf.mxu0  ;;  %v919_v18 = vpop.f32.mrf.mxu1 }
 0x15a   : > { %v1183_v13 = vmul.f32 -1.442695, %v925_v11  ;;  %v932_v17 = vadd.f32 %v880_v12, %v639_v15  ;;  %v940_v30 = vadd.f32 %v939_v27, %v919_v18 }
 0x15b   : > { %v882_v14 = vpop.f32.mrf.mxu0  ;;  %v1246_v20 = vpop.f32.mrf.mxu1 }
 0x15c   : > { %1410 = vpow2.f32 %v1183_v13  ;;  %v1184_v19 = vmul.f32 -1.442695, %v932_v17 }
 0x15d   : > { %v883_v16 = vpop.f32.mrf.mxu0  ;;  %v922_v21 = vpop.f32.mrf.mxu1 }
 0x15e   : > { %1412 = vpow2.f32 %v1184_v19 }
 0x15f   : > { %v1247_v22 = vpop.f32.mrf.mxu1 }
 0x169   : > { %v1411_v23 = vpop.eup %1410 }
 0x16a   : > { %v929_v24 = vadd.f32 1.0, %v1411_v23 }
 0x16b   : > { %v1413_v26 = vpop.eup %1412 }
 0x16c   : > { %1414 = vrcp.f32 %v929_v24  ;;  %v936_v29 = vadd.f32 1.0, %v1413_v26 }
 0x16e   : > { %1416 = vrcp.f32 %v936_v29 }
 0x179   : > { %v1415_v31 = vpop.eup %1414 }
 0x17a   : > { %v941_v33 = vmul.f32 %v1415_v31, %v940_v30 }
 0x17b   : > { %v1417_v35 = vpop.eup %1416 }
 0x17c   : > { %v942_v34 = vadd.f32 %v941_v33, %v678_v32  ;;  %v944_v36 = vsub.f32 1.0, %v1417_v35  ;;  %v946_v39 = vmul.f32 %v1417_v35, %v1919_v53 }
 0x17e   : > { %1418 = vtanh.f32 %v942_v34 }
 0x18b   : > { %v1419_v37 = vpop.eup %1418 }
 0x18c   : > { %v945_v38 = vmul.f32 %v1419_v37, %v944_v36 }
 0x18e   : > { %v947_v40 = vadd.f32 %v946_v39, %v945_v38 }
 0x190   : > { %948 = vst [vmem:[#allocation2] sm:$0x1] %v947_v40  ;;  %949 = vst [vmem:[#allocation11] sm:$0x1] %v947_v40 }
 0x191   : > { %950 = vst [vmem:[%s395_s27] sm:$0x1] %v947_v40 }
 0x192   : > { %1515 = shalt.err (!%p1512_p0)
}
 0x193   : > { %p2036_p1 = pmov %p2035_p9  ;;  %s952_s4 = scalar_lea.sflag [#allocation13], %s1831_s11 }
 0x194   : > { %s1526_s23 = scalar_lea.vmem %s1945_s19, 16  ;;  %s1627_s13 = smov [#allocation12]  }
 0x195   : > { %1263 = dma.vmem_to_hbm [thread:$0]  (%p2036_p1), %s963_s16, 16, %s2009_s7, [#allocation7]  }
 0x196   : > { %p1527_p4 = scmp.ne.s32.totalorder %s1945_s19, %s1526_s23  ;;  %s1530_s0 = sshll.u32 %s1627_s13, 4  ;;  %s1531_s0 = int_to_ptr.vmem [resolvable:$false] %s1530_s0 }
 0x197   : > { %s1532_s26 = scalar_lea.vmem %s1531_s0, 32  ;;  %p1533_p2 = scmp.lt.s32.totalorder %s1945_s19, %s1531_s0 }
 0x198   : > { %p1528_p7 = pnand %p1527_p4, %p1771_p12  ;;  %p1534_p9 = scmp.lt.s32.totalorder %s1532_s26, %s1526_s23 }
 0x19a   : > { %p1529_p11 = pneg %p1528_p7  ;;  %p1535_p10 = por %p1534_p9, %p1533_p2 }
 0x19c   : > { %p1536_p6 = pnand %p1535_p10, %p1529_p11 }
 0x19e   : > { %1539 = shalt.err (!%p1536_p6)
}
 0x19f   : > { %s1540_s16 = scalar_lea.hbm %s1943_s21, 16  ;;  %s1544_s27 = scalar_lea.hbm %s2010_s8, 32 }
 0x1a0   : > { %p1541_p8 = scmp.ne.s32.totalorder %s1943_s21, %s1540_s16  ;;  %p1545_p0 = scmp.lt.s32.totalorder %s1943_s21, %s2010_s8 }
 0x1a1   : > { %p1546_p1 = scmp.lt.s32.totalorder %s1544_s27, %s1540_s16 }
 0x1a2   : > { %p1542_p5 = pnand %p1541_p8, %p1771_p12 }
 0x1a3   : > { %p1547_p4 = por %p1546_p1, %p1545_p0 }
 0x1a4   : > { %p1543_p3 = pneg %p1542_p5 }
 0x1a6   : > { %p1548_p7 = pnand %p1547_p4, %p1543_p3 }
 0x1a8   : > { %1551 = shalt.err (!%p1548_p7)
}
 0x1a9   : > { %1264 = dma.vmem_to_hbm [thread:$0]  (%p1771_p12), %s1945_s19, 16, %s1943_s21, %s952_s4  }
 0x1aa   : > { %p2037_p11 = scmp.eq.s32.totalorder %s1752_s20, 1 }
 0x1ac   : > { %1585 = dma.done.wait (%p2037_p11), [#allocation7], 16   ;;  %p2038_p2 = pmov %p2037_p11 }
 0x1ae   : > { %1587 = vsyncadd (%p2038_p2), [#allocation7], 4294967280 }
 0x1af PF: > { %s991_s28 = sand.u32 1, %s1594_s29   ;;  %p2039_p9 = scmp.ge.s32.totalorder %s1614_s12, 2 }
 0x1b0   : > { %s992_s10 = scalar_lea.sflag [#allocation13], %s991_s28 }
 0x1b1   : > { %p1280_p10 = pnand %p2039_p9, %p1775_p13 }
 0x1b3   : > { %p1281_p6 = pneg %p1280_p10 }
 0x1b5   : > { %1589 = dma.done.wait (%p1281_p6), %s992_s10, 16  }
 0x1b6   : > { %1591 = vsyncadd (%p1281_p6), %s992_s10, 4294967280  ;;  %s28_s12 = sadd.s32 1, %s1614_s12   ;;  %s2040_s10 = sld [smem:[#allocation18_spill]] }
 0x1b7   : > { %p25_p12 = scmp.ge.s32.totalorder %s28_s12, 4   ;;  %s2041_s11 = sld [smem:[#allocation19_spill]] }
 0x1b8   : > { %s2042_s29 = smov %s1598_s30  ;;  %s2043_s30 = smov %s1602_s9 }
 0x1b9   : > { %s2044_s9 = smov %s1724_s18  ;;  %27 = sbr.rel (!%p25_p12) target bundleno = 12 (0xc), region = 129 }
 0x1be   :  { %996 = vsyncpa [#allocation6], 1 }
 0x1bf   :  { %998 = vsyncpa [#allocation6 + $0x1], 1 }
 0x1c0   :  { %999 = vsyncpa [#allocation9], 1 }
 0x1c1   :  { %1001 = vsyncpa [#allocation9 + $0x1], 1 }
 0x1c2   :  { %1002 = vsyncpa [#allocation7], 1 }
 0x1c3   :  { %1004 = vsyncpa [#allocation7 + $0x1], 1 }
 0x1c4   :  { %1005 = vsyncpa [#allocation13], 1 }
 0x1c5   :  { %1007 = vsyncpa [#allocation13 + $0x1], 1 }

</bundles_post_ra>
